<compile_context>
chip_gen: v6e
topology: v6e:2x2x1
jax: 0.10.0
libtpu: 0.0.40
codegen_flags: <defaults>
</compile_context>

<pallas_src>
import functools

import jax
import jax.numpy as jnp
from jax.experimental import pallas as pl
from jax.experimental.pallas import tpu as pltpu


def _round_up(n, m):
    return ((n + m - 1) // m) * m


def _pad_last(a, target):
    pad = target - a.shape[-1]
    if pad == 0:
        return a
    widths = [(0, 0)] * (a.ndim - 1) + [(0, pad)]
    return jnp.pad(a, widths)


# ----------------------------------------------------------------------------
# Fused kernel: conv (im2col matmul) + bias/ReLU + avg-pool accumulate + heads.
# ----------------------------------------------------------------------------
def _hydranet_fused_kernel(p_ref, wc_ref, bc_ref, wh_ref, bh_ref, o_ref,
                           acc_ref, *, inv_hw):
    # p_ref  : (1, hw_blk, K9)  bf16 im2col patches (one image, one row block)
    # wc_ref : (K9, Fp)         bf16 conv weight, taps flattened into K
    # bc_ref : (1, Fp)          f32  conv bias (lane-padded)
    # wh_ref : (Fp, HCp)        bf16 all heads stacked along lanes (head-major)
    # bh_ref : (1, HCp)         f32  all head biases (lane-padded)
    # o_ref  : (1, 1, HCp)      f32  lane-dense fused head output
    # acc_ref: (1, Fp)          f32  pooled-sum accumulator across spatial steps
    j = pl.program_id(1)

    @pl.when(j == 0)
    def _():
        acc_ref[...] = jnp.zeros_like(acc_ref)

    # Conv for this spatial row block: ONE im2col MXU matmul, bf16 in, f32 acc.
    conv = jnp.dot(p_ref[0], wc_ref[...],
                   preferred_element_type=jnp.float32)           # (hw_blk, Fp)

    # Bias + ReLU in f32 on the VPU, then partial spatial sum (XLU reduce).
    feats = jnp.maximum(conv + bc_ref[...], 0.0)
    acc_ref[...] += jnp.sum(feats, axis=0, keepdims=True)

    # Last spatial step: finish the global average pool and run ALL heads in
    # one MXU matmul with a lane-dense (1, HCp) store.
    @pl.when(j == pl.num_programs(1) - 1)
    def _():
        pooled = acc_ref[...] * inv_hw                           # (1, Fp) f32
        out = jnp.dot(pooled.astype(jnp.bfloat16), wh_ref[...],
                      preferred_element_type=jnp.float32) + bh_ref[...]
        o_ref[...] = out.reshape(o_ref.shape).astype(o_ref.dtype)


def _im2col_3x3(x_nhwc):
    # (B, H, W, C) -> (B, H*W, 9*C) with "same" padding; tap order (kh, kw, c)
    # matches enc_w.reshape(9*Cin, F).  XLA fuses pad + slices + concat into a
    # single patch-materialization pass (bf16, so half the bytes of before).
    B, H, W, C = x_nhwc.shape
    xp = jnp.pad(x_nhwc, ((0, 0), (1, 1), (1, 1), (0, 0)))
    cols = [xp[:, kh:kh + H, kw:kw + W, :]
            for kh in range(3) for kw in range(3)]
    return jnp.concatenate(cols, axis=-1).reshape(B, H * W, 9 * C)


def _pick_hw_block(hw, k9, fp, hcp):
    # Per-step VMEM footprint (bytes):
    #   patches: 2 buffers x hw_blk x K9 x 2 (bf16)
    #   conv acc + feats (f32): ~2 x hw_blk x Fp x 4
    #   weights (double-buffered bf16) + f32 biases + pooled accumulator
    # Budget ~12 MiB so one step fits v5e's 16 MiB default scoped VMEM without
    # raising vmem_limit_bytes; v6e/v7x default to 32 MiB (v7x physical VMEM is
    # 64 MiB, so keep tiles roughly half of what v6e could take).
    budget = 12 * 1024 * 1024
    fixed = 2 * 2 * (k9 * fp + fp * hcp) + 4 * (fp + hcp) + 4 * fp
    per_row = 2 * 2 * k9 + 2 * 4 * fp
    max_rows = max(8, (budget - fixed) // per_row)

    if hw % 8 != 0:
        # Full-extent block is always layout-legal; spatial tiling needs
        # sublane-aligned (multiple-of-8) row blocks.
        return hw

    best = 8
    d = 8
    while d <= hw:
        if hw % d == 0 and d <= max_rows:
            best = d
        d += 8

    # Prefer >= 2 spatial steps so BlockSpec double-buffering actually
    # overlaps the patch DMA with MXU work.
    if best == hw and hw > 8:
        for d in range(best - 8, 7, -8):
            if hw % d == 0:
                return d
    return best


# ----------------------------------------------------------------------------
# HydraNet forward
# ----------------------------------------------------------------------------
@jax.jit
def hydranet_forward(x_nchw, params):
    # Layout: NCHW (PyTorch) -> NHWC (TPU lanes = channels); bf16 at the
    # pallas_call boundary, f32 accumulation inside the kernel.
    x = jnp.transpose(x_nchw, (0, 2, 3, 1)).astype(jnp.bfloat16)
    B, H, W, Cin = x.shape
    F = params["enc_w"].shape[-1]
    NH1, _, C = params["head_w"].shape                 # NH1 = num_heads + 1
    HC = NH1 * C
    K9 = 9 * Cin
    HW = H * W

    # Lane-dense padding of the feature / fused-head dims (sliced off below).
    Fp = _round_up(F, 128)
    HCp = _round_up(HC, 128)

    patches = _im2col_3x3(x)                                       # (B, HW, K9) bf16
    wc = _pad_last(params["enc_w"].reshape(K9, F), Fp).astype(jnp.bfloat16)
    bc = _pad_last(params["enc_b"], Fp)                            # (1, Fp)  f32
    wh = jnp.transpose(params["head_w"], (1, 0, 2)).reshape(F, HC)
    wh = _pad_last(jnp.pad(wh, ((0, Fp - F), (0, 0))), HCp).astype(jnp.bfloat16)
    bh = _pad_last(params["head_b"].reshape(1, HC), HCp)           # (1, HCp) f32

    hw_blk = _pick_hw_block(HW, K9, Fp, HCp)
    n_hw = HW // hw_blk

    cost = pl.CostEstimate(
        flops=2 * B * HW * K9 * Fp + 2 * B * Fp * HCp,
        transcendentals=0,
        bytes_accessed=(B * HW * K9 * 2 + (K9 * Fp + Fp * HCp) * 2
                        + (Fp + HCp) * 4 + B * HCp * 4),
    )

    kernel = functools.partial(_hydranet_fused_kernel, inv_hw=1.0 / HW)

    out = pl.pallas_call(
        kernel,
        out_shape=jax.ShapeDtypeStruct((B, 1, HCp), jnp.float32),
        grid=(B, n_hw),
        in_specs=[
            # Im2col patches: one image x one spatial row block per step.
            pl.BlockSpec((1, hw_blk, K9), lambda i, j: (i, j, 0)),
            # Grid-invariant weights / biases (constant index_map -> copied
            # into VMEM once by the pipeline and kept resident).
            pl.BlockSpec((K9, Fp), lambda i, j: (0, 0)),
            pl.BlockSpec((1, Fp), lambda i, j: (0, 0)),
            pl.BlockSpec((Fp, HCp), lambda i, j: (0, 0)),
            pl.BlockSpec((1, HCp), lambda i, j: (0, 0)),
        ],
        out_specs=pl.BlockSpec((1, 1, HCp), lambda i, j: (i, 0, 0)),
        scratch_shapes=[pltpu.VMEM((1, Fp), jnp.float32)],
        compiler_params=pltpu.CompilerParams(
            dimension_semantics=("parallel", "arbitrary")),
        cost_estimate=cost,
    )(patches, wc, bc, wh, bh)

    all_out = jnp.transpose(out[:, 0, :HC].reshape(B, NH1, C), (1, 0, 2))
    t_out = all_out[0]        # target head:  (B, num_classes)
    p_out = all_out[1:]       # pseudo heads: (num_heads, B, num_classes)
    return t_out, p_out


def init_params(key, cin, num_heads, num_features, num_classes):
    k = jax.random.split(key, 4)
    enc_w = 0.1 * jax.random.normal(k[0], (3, 3, cin, num_features), jnp.float32)
    enc_b = 0.01 * jax.random.normal(k[1], (1, num_features), jnp.float32)
    head_w = 0.1 * jax.random.normal(
        k[2], (num_heads + 1, num_features, num_classes), jnp.float32)
    head_b = 0.01 * jax.random.normal(
        k[3], (num_heads + 1, 1, num_classes), jnp.float32)
    return {"enc_w": enc_w, "enc_b": enc_b, "head_w": head_w, "head_b": head_b}


def _reference_forward(x_nchw, params):
    # Pure-JAX f32 reference with identical math (9-tap conv form).
    x = jnp.transpose(x_nchw, (0, 2, 3, 1))
    xp = jnp.pad(x, ((0, 0), (1, 1), (1, 1), (0, 0)))
    B, H, W, Cin = x.shape
    Cout = params["enc_w"].shape[-1]
    acc = jnp.zeros((B, H, W, Cout), jnp.float32)
    for kh in range(3):
        for kw in range(3):
            acc += jnp.einsum("bhwc,cf->bhwf",
                              xp[:, kh:kh + H, kw:kw + W, :],
                              params["enc_w"][kh, kw])
    feats = jnp.maximum(acc + params["enc_b"][0], 0.0)
    pooled = jnp.mean(feats, axis=(1, 2))
    all_out = jnp.einsum("bf,hfc->hbc", pooled, params["head_w"]) + params["head_b"]
    return all_out[0], all_out[1:]


if __name__ == "__main__":
    B, Cin, H, W = 2, 4, 16, 16
    num_heads, num_features, num_classes = 3, 32, 10

    key = jax.random.PRNGKey(0)
    kx, kp = jax.random.split(key)
    x = jax.random.normal(kx, (B, Cin, H, W), jnp.float32)
    params = init_params(kp, Cin, num_heads, num_features, num_classes)

    t_out, p_out = hydranet_forward(x, params)
    jax.block_until_ready((t_out, p_out))

    t_ref, p_ref = _reference_forward(x, params)
    assert t_out.shape == (B, num_classes)
    assert p_out.shape == (num_heads, B, num_classes)
    # bf16 MXU inputs (f32 accumulate) -> compare against f32 ref with 1e-2.
    assert jnp.allclose(t_out, t_ref, atol=1e-2)
    assert jnp.allclose(p_out, p_ref, atol=1e-2)

    print("KERNEL_OK")
</pallas_src>

<mosaic_0001>
module attributes {stable_mosaic.version = 11 : i64} {
  func.func @_hydranet_fused_kernel(%arg0: i32, %arg1: i32, %arg2: memref<1x128x36xbf16, #tpu.memory_space<vmem>>, %arg3: memref<36x128xbf16, #tpu.memory_space<vmem>>, %arg4: memref<1x128xf32, #tpu.memory_space<vmem>>, %arg5: memref<128x128xbf16, #tpu.memory_space<vmem>>, %arg6: memref<1x128xf32, #tpu.memory_space<vmem>>, %arg7: memref<1x1x128xf32, #tpu.memory_space<vmem>>, %arg8: memref<1x128xf32, #tpu.memory_space<vmem>>) attributes {dimension_semantics = [#tpu.dimension_semantics<parallel>, #tpu.dimension_semantics<arbitrary>], iteration_bounds = array<i64: 2, 2>, scalar_prefetch = 0 : i64, scratch_operands = 1 : i64, tpu.core_type = #tpu.core_type<tc>, window_params = [{transform_indices = @transform_0, window_bounds = array<i64: 1, 128, 36>}, {pipeline_mode = #tpu.pipeline_mode<synchronous>, transform_indices = @transform_1, window_bounds = array<i64: 36, 128>}, {pipeline_mode = #tpu.pipeline_mode<synchronous>, transform_indices = @transform_2, window_bounds = array<i64: 1, 128>}, {pipeline_mode = #tpu.pipeline_mode<synchronous>, transform_indices = @transform_3, window_bounds = array<i64: 128, 128>}, {pipeline_mode = #tpu.pipeline_mode<synchronous>, transform_indices = @transform_4, window_bounds = array<i64: 1, 128>}, {transform_indices = @transform_5, window_bounds = array<i64: 1, 1, 128>}]} {
    %c0_i32 = arith.constant 0 : i32
    %0 = arith.cmpi eq, %arg1, %c0_i32 : i32
    %1 = arith.extui %0 : i1 to i32
    %c0_i32_0 = arith.constant 0 : i32
    %2 = arith.cmpi ne, %1, %c0_i32_0 : i32
    scf.if %2 {
      %cst_14 = arith.constant 0.000000e+00 : f32
      %20 = vector.broadcast %cst_14 : f32 to vector<1x128xf32>
      %c0_15 = arith.constant 0 : index
      %c0_16 = arith.constant 0 : index
      %21 = vector.load %arg8[%c0_15, %c0_16] : memref<1x128xf32, #tpu.memory_space<vmem>>, vector<1x128xf32>
      tpu.vector_store %arg8[%c0_15, %c0_16], %20 {strides = array<i32>} : memref<1x128xf32, #tpu.memory_space<vmem>>, vector<1x128xf32>,
    } else {
    }
    %c0 = arith.constant 0 : index
    %c0_1 = arith.constant 0 : index
    %c0_2 = arith.constant 0 : index
    %3 = vector.load %arg2[%c0, %c0_1, %c0_2] : memref<1x128x36xbf16, #tpu.memory_space<vmem>>, vector<1x128x36xbf16>
    %4 = vector.shape_cast %3 : vector<1x128x36xbf16> to vector<128x36xbf16>
    %c0_3 = arith.constant 0 : index
    %c0_4 = arith.constant 0 : index
    %5 = vector.load %arg3[%c0_3, %c0_4] : memref<36x128xbf16, #tpu.memory_space<vmem>>, vector<36x128xbf16>
    %cst = arith.constant dense<0.000000e+00> : vector<128x128xf32>
    %6 = tpu.matmul %4, %5, %cst {dimension_numbers = #tpu.dot_dimension_numbers<[1], [0], [0], [1], [0, 0, 1, 1], [], []>} : vector<128x36xbf16>, vector<36x128xbf16>, vector<128x128xf32> -> vector<128x128xf32>
    %c0_5 = arith.constant 0 : index
    %c0_6 = arith.constant 0 : index
    %7 = vector.load %arg4[%c0_5, %c0_6] : memref<1x128xf32, #tpu.memory_space<vmem>>, vector<1x128xf32>
    %8 = vector.broadcast %7 : vector<1x128xf32> to vector<128x128xf32>
    %9 = arith.addf %6, %8 : vector<128x128xf32>
    %cst_7 = arith.constant 0.000000e+00 : f32
    %10 = vector.broadcast %cst_7 : f32 to vector<128x128xf32>
    %11 = arith.maximumf %9, %10 : vector<128x128xf32>
    %c0_8 = arith.constant 0 : index
    %c0_9 = arith.constant 0 : index
    %12 = vector.load %arg8[%c0_8, %c0_9] : memref<1x128xf32, #tpu.memory_space<vmem>>, vector<1x128xf32>
    %cst_10 = arith.constant dense<0.000000e+00> : vector<128xf32>
    %13 = vector.multi_reduction <add>, %11, %cst_10 [0] : vector<128x128xf32> to vector<128xf32>
    %14 = vector.shape_cast %13 : vector<128xf32> to vector<1x128xf32>
    %15 = arith.addf %12, %14 : vector<1x128xf32>
    %c0_11 = arith.constant 0 : index
    %c0_12 = arith.constant 0 : index
    %16 = vector.load %arg8[%c0_11, %c0_12] : memref<1x128xf32, #tpu.memory_space<vmem>>, vector<1x128xf32>
    tpu.vector_store %arg8[%c0_11, %c0_12], %15 {strides = array<i32>} : memref<1x128xf32, #tpu.memory_space<vmem>>, vector<1x128xf32>,
    %c1_i32 = arith.constant 1 : i32
    %17 = arith.cmpi eq, %arg1, %c1_i32 : i32
    %18 = arith.extui %17 : i1 to i32
    %c0_i32_13 = arith.constant 0 : i32
    %19 = arith.cmpi ne, %18, %c0_i32_13 : i32
    scf.if %19 {
      %c0_14 = arith.constant 0 : index
      %c0_15 = arith.constant 0 : index
      %20 = vector.load %arg8[%c0_14, %c0_15] : memref<1x128xf32, #tpu.memory_space<vmem>>, vector<1x128xf32>
      %cst_16 = arith.constant 3.906250e-03 : f32
      %21 = vector.broadcast %cst_16 : f32 to vector<1x128xf32>
      %22 = arith.mulf %20, %21 : vector<1x128xf32>
      %23 = arith.truncf %22 : vector<1x128xf32> to vector<1x128xbf16>
      %c0_17 = arith.constant 0 : index
      %c0_18 = arith.constant 0 : index
      %24 = vector.load %arg5[%c0_17, %c0_18] : memref<128x128xbf16, #tpu.memory_space<vmem>>, vector<128x128xbf16>
      %cst_19 = arith.constant dense<0.000000e+00> : vector<1x128xf32>
      %25 = tpu.matmul %23, %24, %cst_19 {dimension_numbers = #tpu.dot_dimension_numbers<[1], [0], [0], [1], [0, 0, 1, 1], [], []>} : vector<1x128xbf16>, vector<128x128xbf16>, vector<1x128xf32> -> vector<1x128xf32>
      %c0_20 = arith.constant 0 : index
      %c0_21 = arith.constant 0 : index
      %26 = vector.load %arg6[%c0_20, %c0_21] : memref<1x128xf32, #tpu.memory_space<vmem>>, vector<1x128xf32>
      %27 = arith.addf %25, %26 : vector<1x128xf32>
      %28 = vector.shape_cast %27 : vector<1x128xf32> to vector<1x1x128xf32>
      %c0_22 = arith.constant 0 : index
      %c0_23 = arith.constant 0 : index
      %c0_24 = arith.constant 0 : index
      %29 = vector.load %arg7[%c0_22, %c0_23, %c0_24] : memref<1x1x128xf32, #tpu.memory_space<vmem>>, vector<1x1x128xf32>
      tpu.vector_store %arg7[%c0_22, %c0_23, %c0_24], %28 {strides = array<i32>} : memref<1x1x128xf32, #tpu.memory_space<vmem>>, vector<1x1x128xf32>,
    } else {
    }
    return
  }
  func.func @transform_0(%arg0: i32, %arg1: i32) -> (i32, i32, i32) {
    %c0_i32 = arith.constant 0 : i32
    %c0_i32_0 = arith.constant 0 : i32
    return %arg0, %arg1, %c0_i32 : i32, i32, i32
  }
  func.func @transform_1(%arg0: i32, %arg1: i32) -> (i32, i32) {
    %c0_i32 = arith.constant 0 : i32
    %c0_i32_0 = arith.constant 0 : i32
    %c0_i32_1 = arith.constant 0 : i32
    return %c0_i32, %c0_i32_0 : i32, i32
  }
  func.func @transform_2(%arg0: i32, %arg1: i32) -> (i32, i32) {
    %c0_i32 = arith.constant 0 : i32
    %c0_i32_0 = arith.constant 0 : i32
    %c0_i32_1 = arith.constant 0 : i32
    return %c0_i32, %c0_i32_0 : i32, i32
  }
  func.func @transform_3(%arg0: i32, %arg1: i32) -> (i32, i32) {
    %c0_i32 = arith.constant 0 : i32
    %c0_i32_0 = arith.constant 0 : i32
    %c0_i32_1 = arith.constant 0 : i32
    return %c0_i32, %c0_i32_0 : i32, i32
  }
  func.func @transform_4(%arg0: i32, %arg1: i32) -> (i32, i32) {
    %c0_i32 = arith.constant 0 : i32
    %c0_i32_0 = arith.constant 0 : i32
    %c0_i32_1 = arith.constant 0 : i32
    return %c0_i32, %c0_i32_0 : i32, i32
  }
  func.func @transform_5(%arg0: i32, %arg1: i32) -> (i32, i32, i32) {
    %c0_i32 = arith.constant 0 : i32
    %c0_i32_0 = arith.constant 0 : i32
    %c0_i32_1 = arith.constant 0 : i32
    return %arg0, %c0_i32, %c0_i32_0 : i32, i32, i32
  }
}

</mosaic_0001>

<bundles_post_ra>
// kernel: squeeze.2
= control target key start
LH: loop header
LB: loop body
LE: loop exit
PB: predicated region body
PF: predicated region fallthrough
CT: control target
= control target key end

     0   :  { %s47_s8 = smov 98   ;;  %vm8_vm0 = vcmask 80896   ;;  %s48_s9 = smov 108   ;;  %s68_s0 = inlined_call_operand.vmem [shape: f32[2,40], index: 0, kind: input, shape index: {}]   ;;  %s69_s1 = inlined_call_operand.vmem [shape: f32[2,4,10], index: 1, kind: output, shape index: {}]  }
   0x1   :  { %v5_v0 = vld [vmem:[%s68_s0] sm:$0x3]  ;;  %s46_s0 = smov 118  }
   0x2   :  { %6 = vst [vmem:[#allocation1] sm:$0x3] %v5_v0 }
   0x9   :  { %v10_v1 = vld [vmem:[#allocation1] sm:$0x3]  }
   0xa   :  { %v22_v2 = vld [vmem:[#allocation1] sm:$0x3]   ;;  %11 = vrot.lane.b32.xlu0 %v10_v1, %s46_s0 }
   0xb   :  { %23 = vrot.lane.b32.xlu1 %v22_v2, %s47_s8  ;;  %v7_v3 = vld [vmem:[#allocation1] sm:$0x3]  }
   0xc   :  { %v16_v4 = vld [vmem:[#allocation1] sm:$0x3]   ;;  %9 = vst.msk [vmem:[#allocation0] ss:$8 sm:$0x3] %vm8_vm0, %v7_v3  }
   0xe   :  { %17 = vrot.lane.b32.xlu0 %v16_v4, %s48_s9 }
  0x7c   :  { %v12_v5 = vpop.permute.xlu0 %11  }
  0x7d   :  { %v24_v6 = vpop.permute.xlu1 %23   ;;  %15 = vst.msk [vmem:[#allocation0 + $0x1] ss:$8 sm:$0x3] %vm8_vm0, %v12_v5  }
  0x7e   :  { %27 = vst.msk [vmem:[#allocation0 + $0x3] ss:$8 sm:$0x3] %vm8_vm0, %v24_v6  }
  0x80   :  { %v18_v7 = vpop.permute.xlu0 %17  }
  0x81   :  { %21 = vst.msk [vmem:[#allocation0 + $0x2] ss:$8 sm:$0x3] %vm8_vm0, %v18_v7  }
  0x88   :  { %v32_v8 = vld [vmem:[#allocation0] sm:$0xf]  ;;  %v37_v9 = vld [vmem:[#allocation0 + $0x8] sm:$0xf] }
  0x89   :  { %35 = vst [vmem:[%s69_s1] sm:$0xf] %v32_v8  ;;  %42 = vst [vmem:[%s69_s1 + $0x4] sm:$0xf] %v37_v9 }

// kernel: hydranet_forward.1
= control target key start
LH: loop header
LB: loop body
LE: loop exit
PB: predicated region body
PF: predicated region fallthrough
CT: control target
= control target key end

     0   :  { %s926_s18 = smov 0   ;;  %s928_s19 = smov 0   ;;  %s1048_s0 = inlined_call_operand.vmem [shape: bf16[2,256,36], index: 0, kind: input, shape index: {}]   ;;  %s1049_s1 = inlined_call_operand.vmem [shape: bf16[36,128], index: 1, kind: input, shape index: {}]   ;;  %s1050_s2 = inlined_call_operand.vmem [shape: f32[1,128], index: 2, kind: input, shape index: {}]   ;;  %s1051_s3 = inlined_call_operand.vmem [shape: bf16[128,128], index: 3, kind: input, shape index: {}]   ;;  %s1052_s4 = inlined_call_operand.vmem [shape: f32[1,128], index: 4, kind: input, shape index: {}]   ;;  %s1053_s5 = inlined_call_operand.vmem [shape: f32[2,1,128], index: 5, kind: output, shape index: {}]  }
   0x1   :  { %s930_s20 = smov 0   ;;  %s932_s21 = smov 0  }
   0x2   :  { %s934_s22 = smov 0  }
   0x3 LB: > { %s24_s23 = sadd.s32 1, %s883_s20  ;;  %s27_s24 = sadd.s32 1, %s887_s21  ;;  %s891_s22 = sphi %s934_s22, %s15_s22   ;;  %s887_s21 = sphi %s932_s21, %s1057_s21   ;;  %s883_s20 = sphi %s930_s20, %s1056_s20   ;;  %s879_s19 = sphi %s928_s19, %s1055_s19   ;;  %s875_s18 = sphi %s926_s18, %s1054_s18  }
   0x4   : > { %p25_p0 = scmp.ge.s32.totalorder %s24_s23, 2  ;;  %p685_p1 = scmp.ge.s32.totalorder %s891_s22, 1 }
   0x5   : > { %p206_p2 = scmp.lt.s32.totalorder %s891_s22, 5 }
   0x6   : > { %s1059_s23 = smov (%p25_p0, %s24_s23), 0  ;;  %s1061_s24 = smov (!%p25_p0, %s27_s24), %s887_s21 }
   0x7   : > { %p207_p3 = pnand %p685_p1, %p206_p2  ;;  %p29_p4 = scmp.ge.s32.totalorder %s1061_s24, 2 }
   0x8   : > { %s686_s25 = sshll.u32 (!%p207_p3), %s875_s18, 4  ;;  %p237_p5 = scmp.lt.s32.totalorder (!%p207_p3), %s879_s19, 1 }
   0x9   : > { %s1063_s24 = smov (%p29_p4, %s1061_s24), 0  ;;  %210 = sbr.rel (%p207_p3) target bundleno = 516 (0x204), region = 40 }
   0xa   : > { %p239_p6 = scmp.lt.s32.totalorder (!%p207_p3), %s686_s25, 31  ;;  %p689_p7 = scmp.ne.s32.totalorder (!%p207_p3), %s875_s18, 0 }
   0xe   : > { %s1065_s19 = smov (!%p237_p5, %s879_s19), 1  ;;  %s1067_s25 = smov (!%p239_p6, %s686_s25), 31 }
   0xf   : > { %s687_s26 = sshll.u32 %s1065_s19, 5  ;;  %s248_s29 = scalar_lea.vmem %s1053_s5, %s1065_s19 }
  0x10   : > { %s242_s30 = sadd.s32 %s687_s26, %s1067_s25  ;;  %253 = sbr.rel (%p689_p7) target bundleno = 23 (0x17), region = 44 }
  0x11   : > { %s688_s6 = sshll.u32 %s242_s30, 2 }
  0x12   : > { %s969_s9 = scalar_lea.vmem %s1048_s0, %s688_s6 }
  0x15   : > { %v893_v0 = vmov 0.0  }
  0x16   : > { %254 = vst [vmem:[#allocation2] sm:$0x1] %v893_v0 }
  0x17 PF: > { %v834_v1 = vld [vmem:[%s1049_s1 + $0x10] ss:$0 sps:$4 sm:$0x33]   ;;  %vm363_vm0 = vcmask 1041408   ;;  %v835_v2 = vld [vmem:[%s1049_s1 + $0x8] sm:$0xff]   ;;  %vm338_vm1 = vcmask 293888  }
  0x18   : > { %789 = vmatprep.subr.msk.bf16.mxu0 %vm363_vm0, %v834_v1  ;;  %v365_v3 = vsel %vm363_vm0, %v834_v1, 0  ;;  %790 = vmatprep.subr.msk.bf16.mxu1 %vm363_vm0, %v834_v1  ;;  %v837_v4 = vld [vmem:[%s969_s9] sm:$0xff]   ;;  %v838_v7 = vld [vmem:[%s969_s9 + $0x8] sm:$0xff]   ;;  %v839_v9 = vld [vmem:[%s969_s9 + $0x10] sm:$0xff]   ;;  %p710_p8 = scmp.ne.s32.totalorder %s875_s18, 1 }
  0x19   : > { %742 = vmatpush3.bf16.msra.mxu0 %v365_v3  ;;  %786 = vmatpush3.bf16.msra.mxu1 %v365_v3  ;;  %v836_v5 = vld [vmem:[%s1049_s1] sm:$0xff]   ;;  %v842_v8 = vld [vmem:[%s969_s9 + $0x28] sm:$0xff]   ;;  %v843_v10 = vld [vmem:[%s969_s9 + $0x30] sm:$0xff]  }
  0x1a   : > { %743 = vmatprep.subr.bf16.mxu0 %v835_v2  ;;  %784 = vmatprep.subr.bf16.mxu1 %v835_v2  ;;  %v841_v6 = vld [vmem:[%s969_s9 + $0x20] sm:$0xff]   ;;  %v840_v11 = vld [vmem:[%s969_s9 + $0x18] sm:$0xff]  }
  0x1b   : > { %747 = vmatprep.mubr.msk.bf16.mxu0 %vm338_vm1, %v837_v4  ;;  %755 = vmatprep.mubr.msk.bf16.mxu1 %vm338_vm1, %v841_v6  ;;  %v844_v12 = vld [vmem:[%s969_s9 + $0x38] sm:$0xff]   ;;  %v690_v17 = vld [vmem:[%s1050_s2] ss:$0 sm:$0xff] }
  0x1d   : > { %744 = vmatpush3.bf16.msra.mxu0 %v835_v2  ;;  %787 = vmatpush3.bf16.msra.mxu1 %v835_v2 }
  0x1e   : > { %745 = vmatprep.subr.bf16.mxu0 %v836_v5  ;;  %785 = vmatprep.subr.bf16.mxu1 %v836_v5 }
  0x21   : > { %746 = vmatpush3.bf16.msra.mxu0 %v836_v5  ;;  %788 = vmatpush3.bf16.msra.mxu1 %v836_v5 }
  0x24   : > { %748 = vmatmul.mubr.msk.bf16.vlgmr.msra.gmra.mxu0 %vm338_vm1, %v838_v7  ;;  %756 = vmatmul.mubr.msk.bf16.vlgmr.msra.gmra.mxu1 %vm338_vm1, %v842_v8 }
  0x25   : > { %751 = vmatprep.mubr.msk.bf16.mxu0 %vm338_vm1, %v839_v9  ;;  %759 = vmatprep.mubr.msk.bf16.mxu1 %vm338_vm1, %v843_v10 }
  0x2c   : > { %752 = vmatmul.mubr.msk.bf16.gmra.mxu0 %vm338_vm1, %v840_v11  ;;  %760 = vmatmul.mubr.msk.bf16.gmra.mxu1 %vm338_vm1, %v844_v12 }
  0xe4   : > { %v749_v13 = vpop.f32.mrf.mxu0  ;;  %v757_v14 = vpop.f32.mrf.mxu1 }
  0xe5   : > { %v410_v22 = vadd.f32 %v749_v13, %v690_v17  ;;  %v442_v53 = vadd.f32 %v757_v14, %v690_v17 }
  0xe6   : > { %v401_v15 = vpop.f32.mrf.mxu0  ;;  %v433_v16 = vpop.f32.mrf.mxu1 }
  0xe7   : > { %v402_v19 = vadd.f32 %v690_v17, %v401_v15  ;;  %v466_v30 = vmax.f32 %v410_v22, 0.0  ;;  %v434_v47 = vadd.f32 %v690_v17, %v433_v16  ;;  %v474_v60 = vmax.f32 %v442_v53, 0.0 }
  0xe8   : > { %v750_v18 = vpop.f32.mrf.mxu0  ;;  %v758_v21 = vpop.f32.mrf.mxu1 }
  0xe9   : > { %v464_v25 = vmax.f32 %v402_v19, 0.0  ;;  %v413_v26 = vadd.f32 %v750_v18, %v690_v17  ;;  %v472_v54 = vmax.f32 %v434_v47, 0.0  ;;  %v445_v56 = vadd.f32 %v758_v21, %v690_v17  ;;  %v480_v19 = vld [vmem:[#allocation2] sm:$0x1] }
  0xea   : > { %v404_v20 = vpop.f32.mrf.mxu0  ;;  %v436_v29 = vpop.f32.mrf.mxu1 }
  0xeb   : > { %v405_v23 = vadd.f32 %v690_v17, %v404_v20  ;;  %v467_v34 = vmax.f32 %v413_v26, 0.0  ;;  %v437_v51 = vadd.f32 %v690_v17, %v436_v29  ;;  %v475_v63 = vmax.f32 %v445_v56, 0.0 }
  0xec   : > { %v753_v24 = vpop.f32.mrf.mxu0  ;;  %v761_v37 = vpop.f32.mrf.mxu1 }
  0xed   : > { %v465_v27 = vmax.f32 %v405_v23, 0.0  ;;  %v426_v38 = vadd.f32 %v753_v24, %v690_v17  ;;  %v473_v57 = vmax.f32 %v437_v51, 0.0  ;;  %v458_v2 = vadd.f32 %v761_v37, %v690_v17 }
  0xee   : > { %v417_v28 = vpop.f32.mrf.mxu0  ;;  %v449_v45 = vpop.f32.mrf.mxu1 }
  0xef   : > { %v481_v31 = vadd.f32 %v465_v27, %v464_v25  ;;  %v418_v32 = vadd.f32 %v690_v17, %v417_v28  ;;  %v470_v46 = vmax.f32 %v426_v38, 0.0  ;;  %v450_v62 = vadd.f32 %v690_v17, %v449_v45 }
  0xf0   : > { %v754_v33 = vpop.f32.mrf.mxu0  ;;  %v762_v52 = vpop.f32.mrf.mxu1  ;;  %v478_v8 = vmax.f32 %v458_v2, 0.0 }
  0xf1   : > { %v482_v35 = vadd.f32 %v481_v31, %v466_v30  ;;  %v468_v39 = vmax.f32 %v418_v32, 0.0  ;;  %v429_v43 = vadd.f32 %v754_v33, %v690_v17  ;;  %v476_v3 = vmax.f32 %v450_v62, 0.0 }
  0xf2   : > { %v420_v36 = vpop.f32.mrf.mxu0  ;;  %v452_v59 = vpop.f32.mrf.mxu1  ;;  %v461_v6 = vadd.f32 %v762_v52, %v690_v17 }
  0xf3   : > { %v483_v40 = vadd.f32 %v482_v35, %v467_v34  ;;  %v421_v41 = vadd.f32 %v690_v17, %v420_v36  ;;  %v471_v49 = vmax.f32 %v429_v43, 0.0  ;;  %v453_v1 = vadd.f32 %v690_v17, %v452_v59 }
  0xf4   : > { %v479_v10 = vmax.f32 %v461_v6, 0.0 }
  0xf5   : > { %v484_v42 = vadd.f32 %v483_v40, %v468_v39  ;;  %v469_v44 = vmax.f32 %v421_v41, 0.0  ;;  %v477_v7 = vmax.f32 %v453_v1, 0.0 }
  0xf7   : > { %v485_v48 = vadd.f32 %v484_v42, %v469_v44 }
  0xf9   : > { %v486_v50 = vadd.f32 %v485_v48, %v470_v46 }
  0xfb   : > { %v487_v55 = vadd.f32 %v486_v50, %v471_v49 }
  0xfd   : > { %v488_v58 = vadd.f32 %v487_v55, %v472_v54 }
  0xff   : > { %v489_v61 = vadd.f32 %v488_v58, %v473_v57 }
 0x101   : > { %v490_v0 = vadd.f32 %v489_v61, %v474_v60 }
 0x103   : > { %v491_v4 = vadd.f32 %v490_v0, %v475_v63 }
 0x105   : > { %v492_v5 = vadd.f32 %v491_v4, %v476_v3 }
 0x107   : > { %v493_v9 = vadd.f32 %v492_v5, %v477_v7 }
 0x109   : > { %v494_v11 = vadd.f32 %v493_v9, %v478_v8 }
 0x10b   : > { %v495_v12 = vadd.f32 %v494_v11, %v479_v10 }
 0x10d   : > { %v496_v13 = vrot.slane %v495_v12, 4 }
 0x10f   : > { %v497_v14 = vadd.f32 %v496_v13, %v495_v12 }
 0x111   : > { %v498_v15 = vrot.slane %v497_v14, 2 }
 0x113   : > { %v499_v16 = vadd.f32 %v498_v15, %v497_v14 }
 0x115   : > { %v500_v18 = vrot.slane %v499_v16, 1 }
 0x117   : > { %v501_v20 = vadd.f32 %v500_v18, %v499_v16  ;;  %507 = sbr.rel (%p710_p8) target bundleno = 516 (0x204), region = 48 }
 0x119   : > { %v502_v21 = vadd.f32 %v501_v20, %v480_v19 }
 0x11b   : > { %503 = vst [vmem:[#allocation2] sm:$0x1] %v502_v21 }
 0x11c   : > { %v845_v17 = vld [vmem:[%s1051_s3 + $0x38] sm:$0xff]   ;;  %v894_v22 = vmov 0.0   ;;  %v846_v23 = vld [vmem:[%s1051_s3 + $0x30] sm:$0xff]   ;;  %vm895_vm2 = vmmov 0   ;;  %v847_v24 = vld [vmem:[%s1051_s3 + $0x28] sm:$0xff]  }
 0x11d   : > { %763 = vmatprep.subr.bf16.mxu0 %v894_v22  ;;  %779 = vmatprep.mubr.msk.bf16.mxu0 %vm895_vm2, %v894_v22  ;;  %v848_v25 = vld [vmem:[%s1051_s3 + $0x20] sm:$0xff]   ;;  %v849_v26 = vld [vmem:[%s1051_s3 + $0x18] sm:$0xff]   ;;  %v850_v27 = vld [vmem:[%s1051_s3 + $0x10] sm:$0xff]  }
 0x11e   : > { %764 = vmatpush3.bf16.msra.mxu0 %v845_v17  ;;  %v851_v28 = vld [vmem:[%s1051_s3 + $0x8] sm:$0xff]   ;;  %v852_v31 = vld [vmem:[%s1051_s3] sm:$0xff]  }
 0x11f   : > { %765 = vmatprep.subr.bf16.mxu0 %v894_v22  ;;  %v527_v33 = vld [vmem:[%s1052_s4] sm:$0x1] }
 0x122   : > { %766 = vmatpush3.bf16.msra.mxu0 %v846_v23  ;;  %v508_v29 = vld [vmem:[#allocation2] sm:$0x1] }
 0x123   : > { %767 = vmatprep.subr.bf16.mxu0 %v894_v22  ;;  %v509_v30 = vmul.f32 0.00390625, %v508_v29 }
 0x125   : > { %v510_v32 = vpack.c.bf16 %v509_v30, %v509_v30 }
 0x126   : > { %768 = vmatpush3.bf16.msra.mxu0 %v847_v24 }
 0x127   : > { %769 = vmatprep.subr.bf16.mxu0 %v894_v22 }
 0x12a   : > { %770 = vmatpush3.bf16.msra.mxu0 %v848_v25 }
 0x12b   : > { %771 = vmatprep.subr.bf16.mxu0 %v894_v22 }
 0x12e   : > { %772 = vmatpush3.bf16.msra.mxu0 %v849_v26 }
 0x12f   : > { %773 = vmatprep.subr.bf16.mxu0 %v894_v22 }
 0x132   : > { %774 = vmatpush3.bf16.msra.mxu0 %v850_v27 }
 0x133   : > { %775 = vmatprep.subr.bf16.mxu0 %v894_v22 }
 0x136   : > { %776 = vmatpush3.bf16.msra.mxu0 %v851_v28 }
 0x137   : > { %777 = vmatprep.subr.bf16.mxu0 %v894_v22 }
 0x13a   : > { %778 = vmatpush3.bf16.msra.mxu0 %v852_v31 }
 0x13d   : > { %780 = vmatmul.mubr.bf16.vlgmr.msra.gmra.mxu0 %v510_v32 }
 0x1fd   : > { %v610_v34 = vpop.f32.mrf.mxu0 }
 0x1fe   : > { %v611_v35 = vadd.f32 %v610_v34, %v527_v33 }
 0x1ff   : > { %v781_v36 = vpop.f32.mrf.mxu0 }
 0x200   : > { %616 = vst [vmem:[%s248_s29] sm:$0x1] %v611_v35 }
 0x201   : > { %v613_v37 = vpop.f32.mrf.mxu0 }
 0x203   : > { %v782_v38 = vpop.f32.mrf.mxu0 }
 0x204 PF: > { %s15_s22 = sadd.s32 1, %s891_s22   ;;  %s1054_s18 = smov %s883_s20 }
 0x205   : > { %p12_p9 = scmp.ge.s32.totalorder %s15_s22, 6   ;;  %s1055_s19 = smov %s887_s21 }
 0x206   : > { %s1056_s20 = smov %s1059_s23  ;;  %s1057_s21 = smov %s1063_s24 }
 0x207   :  { %14 = sbr.rel (!%p12_p9) target bundleno = 3 (0x3), region = 78 }

</bundles_post_ra>
